<compile_context>
chip_gen: v7x
topology: tpu7x:2x2x1
jax: 0.10.0
libtpu: 0.0.40
codegen_flags: <defaults>
</compile_context>

<pallas_src>
import math

import jax
import jax.numpy as jnp
from jax.experimental import pallas as pl
from jax.experimental.pallas import tpu as pltpu


def actor_kernel(xT_ref, w1_ref, b1_ref, w2_ref, b2_ref, w3_ref, b3_ref, muT_ref):
    # Transposed formulation: x^T is (in_dim, tb) with batch on lanes.
    xT = xT_ref[...]
    # fc1 + ReLU: (fc1, in) @ (in, tb) -> (fc1, tb)
    h1 = jnp.dot(w1_ref[...], xT, preferred_element_type=jnp.float32)
    h1 = jnp.maximum(h1 + b1_ref[...], 0.0)
    # fc2 + ReLU: (fc2, fc1) @ (fc1, tb) -> (fc2, tb)
    h2 = jnp.dot(w2_ref[...], h1, preferred_element_type=jnp.float32)
    h2 = jnp.maximum(h2 + b2_ref[...], 0.0)
    # mu + tanh: (n_act, fc2) @ (fc2, tb) -> (n_act, tb), lane-dense store.
    mu = jnp.dot(w3_ref[...], h2, preferred_element_type=jnp.float32)
    muT_ref[...] = jnp.tanh(mu + b3_ref[...]).astype(muT_ref.dtype)


def _round_up(x, m):
    return ((x + m - 1) // m) * m


def _xla_forward(state, params):
    """Plain fused XLA forward (reference / tiny-batch fast path)."""
    w1, b1, w2, b2, w3, b3 = params
    h1 = jnp.maximum(state @ w1.T + b1.reshape(1, -1), 0.0)
    h2 = jnp.maximum(h1 @ w2.T + b2.reshape(1, -1), 0.0)
    return jnp.tanh(h2 @ w3.T + b3.reshape(1, -1))


def actor_forward(state, params, *, tile_batch=2048, min_kernel_batch=65):
    """state: (batch, input_dim) f32; params follow PyTorch nn.Linear layout
    (w: (out, in), b: (out,) or (1, out)).  Returns (batch, n_actions)."""
    w1, b1, w2, b2, w3, b3 = params
    batch, in_dim = state.shape
    fc1_dims = w1.shape[0]
    fc2_dims = w2.shape[0]
    n_actions = w3.shape[0]

    # Tiny batches: kernel launch + pipeline prologue + padding would dominate;
    # plain XLA matches or beats the kernel here.
    if batch < min_kernel_batch:
        return _xla_forward(state, params)

    # --- one-time layout plumbing (cheap XLA ops) ---------------------------
    # Biases as column vectors for the transposed formulation (broadcast along
    # the lane/batch axis inside the kernel).
    b1c = b1.reshape(fc1_dims, 1)
    b2c = b2.reshape(fc2_dims, 1)
    b3c = b3.reshape(n_actions, 1)

    # Grid sizing: tiles are multiples of 128 lanes, capped at `tile_batch`
    # rows, and the step count is always an even number >= 2 so both v7x
    # TensorCores get work under the "parallel" batch axis.
    tile_batch = max(128, _round_up(tile_batch, 128))
    n_steps = max(2, 2 * math.ceil(batch / (2 * tile_batch)))
    tb = _round_up(math.ceil(batch / n_steps), 128)
    b_pad = n_steps * tb

    # Transposed, lane-padded state: (in_dim, b_pad), batch on the lane axis.
    xT = jnp.zeros((in_dim, b_pad), state.dtype).at[:, :batch].set(state.T)

    muT = pl.pallas_call(
        actor_kernel,
        out_shape=jax.ShapeDtypeStruct((n_actions, b_pad), jnp.float32),
        grid_spec=pltpu.PrefetchScalarGridSpec(
            num_scalar_prefetch=0,
            grid=(n_steps,),
            in_specs=[
                # state^T: streamed / double-buffered along the batch (lane) axis.
                pl.BlockSpec((in_dim, tb), lambda i: (0, i)),
                # Weights & biases: whole-array blocks, VMEM-resident across steps
                # (native (out, in) layout — no transpose needed for w @ x^T).
                pl.BlockSpec(w1.shape, lambda i: (0, 0)),
                pl.BlockSpec(b1c.shape, lambda i: (0, 0)),
                pl.BlockSpec(w2.shape, lambda i: (0, 0)),
                pl.BlockSpec(b2c.shape, lambda i: (0, 0)),
                pl.BlockSpec(w3.shape, lambda i: (0, 0)),
                pl.BlockSpec(b3c.shape, lambda i: (0, 0)),
            ],
            out_specs=pl.BlockSpec((n_actions, tb), lambda i: (0, i)),
        ),
        compiler_params=pltpu.CompilerParams(
            dimension_semantics=("parallel",),
        ),
    )(xT, w1, b1c, w2, b2c, w3, b3c)

    # Strip the lane (batch) padding and return in natural (batch, n_actions).
    return muT[:, :batch].T


def init_linear(key, in_dim, out_dim):
    # Deterministic init mirroring PyTorch nn.Linear default: U(-1/sqrt(in), 1/sqrt(in))
    kw, kb = jax.random.split(key)
    bound = 1.0 / jnp.sqrt(jnp.float32(in_dim))
    w = jax.random.uniform(kw, (out_dim, in_dim), jnp.float32, -bound, bound)
    b = jax.random.uniform(kb, (1, out_dim), jnp.float32, -bound, bound)
    return w, b


if __name__ == "__main__":
    # Shapes consistent with ActorNetwork(input_dims=[8], fc1_dims=32,
    # fc2_dims=32, n_actions=4).
    batch, input_dim, fc1_dims, fc2_dims, n_actions = 2, 8, 32, 32, 4

    key = jax.random.PRNGKey(0)
    k_x, k1, k2, k3 = jax.random.split(key, 4)

    state = jax.random.normal(k_x, (batch, input_dim), jnp.float32)
    w1, b1 = init_linear(k1, input_dim, fc1_dims)
    w2, b2 = init_linear(k2, fc1_dims, fc2_dims)
    w3, b3 = init_linear(k3, fc2_dims, n_actions)
    params = (w1, b1, w2, b2, w3, b3)

    # Tiny-batch path (fused XLA short-circuit).
    mu_small = actor_forward(state, params)
    jax.block_until_ready(mu_small)
    assert mu_small.shape == (batch, n_actions), "bad output shape (small batch)"
    assert jnp.allclose(mu_small, _xla_forward(state, params), atol=1e-5), \
        "mismatch vs reference (small batch)"

    # Pallas path: 2-step grid with batch padding (batch=1000 -> tb=512, 2 steps).
    big_batch = 1000
    big_state = jax.random.normal(jax.random.PRNGKey(1), (big_batch, input_dim),
                                  jnp.float32)
    mu_big = actor_forward(big_state, params)
    jax.block_until_ready(mu_big)
    assert mu_big.shape == (big_batch, n_actions), "bad output shape (big batch)"
    assert jnp.allclose(mu_big, _xla_forward(big_state, params), atol=1e-4), \
        "mismatch vs reference (big batch)"

    # Larger batch exercising a 4-step (even) grid and wide lane tiles.
    bigger_batch = 5000
    st2 = jax.random.normal(jax.random.PRNGKey(2), (bigger_batch, input_dim),
                            jnp.float32)
    mu2 = actor_forward(st2, params)
    jax.block_until_ready(mu2)
    assert mu2.shape == (bigger_batch, n_actions), "bad output shape (bigger batch)"
    assert jnp.allclose(mu2, _xla_forward(st2, params), atol=1e-4), \
        "mismatch vs reference (bigger batch)"

    print("KERNEL_OK")
</pallas_src>

<mosaic_0001>
module attributes {stable_mosaic.version = 11 : i64} {
  func.func @actor_kernel(%arg0: i32, %arg1: memref<8x512xf32, #tpu.memory_space<vmem>>, %arg2: memref<32x8xf32, #tpu.memory_space<vmem>>, %arg3: memref<32x1xf32, #tpu.memory_space<vmem>>, %arg4: memref<32x32xf32, #tpu.memory_space<vmem>>, %arg5: memref<32x1xf32, #tpu.memory_space<vmem>>, %arg6: memref<4x32xf32, #tpu.memory_space<vmem>>, %arg7: memref<4x1xf32, #tpu.memory_space<vmem>>, %arg8: memref<4x512xf32, #tpu.memory_space<vmem>>) attributes {dimension_semantics = [#tpu.dimension_semantics<parallel>], iteration_bounds = array<i64: 2>, scalar_prefetch = 0 : i64, scratch_operands = 0 : i64, tpu.core_type = #tpu.core_type<tc>, window_params = [{transform_indices = @transform_0, window_bounds = array<i64: 8, 512>}, {pipeline_mode = #tpu.pipeline_mode<synchronous>, transform_indices = @transform_1, window_bounds = array<i64: 32, 8>}, {pipeline_mode = #tpu.pipeline_mode<synchronous>, transform_indices = @transform_2, window_bounds = array<i64: 32, 1>}, {pipeline_mode = #tpu.pipeline_mode<synchronous>, transform_indices = @transform_3, window_bounds = array<i64: 32, 32>}, {pipeline_mode = #tpu.pipeline_mode<synchronous>, transform_indices = @transform_4, window_bounds = array<i64: 32, 1>}, {pipeline_mode = #tpu.pipeline_mode<synchronous>, transform_indices = @transform_5, window_bounds = array<i64: 4, 32>}, {pipeline_mode = #tpu.pipeline_mode<synchronous>, transform_indices = @transform_6, window_bounds = array<i64: 4, 1>}, {transform_indices = @transform_7, window_bounds = array<i64: 4, 512>}]} {
    %c0 = arith.constant 0 : index
    %c0_0 = arith.constant 0 : index
    %0 = vector.load %arg1[%c0, %c0_0] : memref<8x512xf32, #tpu.memory_space<vmem>>, vector<8x512xf32>
    %c0_1 = arith.constant 0 : index
    %c0_2 = arith.constant 0 : index
    %1 = vector.load %arg2[%c0_1, %c0_2] : memref<32x8xf32, #tpu.memory_space<vmem>>, vector<32x8xf32>
    %cst = arith.constant dense<0.000000e+00> : vector<32x512xf32>
    %2 = tpu.matmul %1, %0, %cst {dimension_numbers = #tpu.dot_dimension_numbers<[1], [0], [0], [1], [0, 0, 1, 1], [], []>} : vector<32x8xf32>, vector<8x512xf32>, vector<32x512xf32> -> vector<32x512xf32>
    %c0_3 = arith.constant 0 : index
    %c0_4 = arith.constant 0 : index
    %3 = vector.load %arg3[%c0_3, %c0_4] : memref<32x1xf32, #tpu.memory_space<vmem>>, vector<32x1xf32>
    %4 = vector.broadcast %3 : vector<32x1xf32> to vector<32x512xf32>
    %5 = arith.addf %2, %4 : vector<32x512xf32>
    %cst_5 = arith.constant 0.000000e+00 : f32
    %6 = vector.broadcast %cst_5 : f32 to vector<32x512xf32>
    %7 = arith.maximumf %5, %6 : vector<32x512xf32>
    %c0_6 = arith.constant 0 : index
    %c0_7 = arith.constant 0 : index
    %8 = vector.load %arg4[%c0_6, %c0_7] : memref<32x32xf32, #tpu.memory_space<vmem>>, vector<32x32xf32>
    %cst_8 = arith.constant dense<0.000000e+00> : vector<32x512xf32>
    %9 = tpu.matmul %8, %7, %cst_8 {dimension_numbers = #tpu.dot_dimension_numbers<[1], [0], [0], [1], [0, 0, 1, 1], [], []>} : vector<32x32xf32>, vector<32x512xf32>, vector<32x512xf32> -> vector<32x512xf32>
    %c0_9 = arith.constant 0 : index
    %c0_10 = arith.constant 0 : index
    %10 = vector.load %arg5[%c0_9, %c0_10] : memref<32x1xf32, #tpu.memory_space<vmem>>, vector<32x1xf32>
    %11 = vector.broadcast %10 : vector<32x1xf32> to vector<32x512xf32>
    %12 = arith.addf %9, %11 : vector<32x512xf32>
    %cst_11 = arith.constant 0.000000e+00 : f32
    %13 = vector.broadcast %cst_11 : f32 to vector<32x512xf32>
    %14 = arith.maximumf %12, %13 : vector<32x512xf32>
    %c0_12 = arith.constant 0 : index
    %c0_13 = arith.constant 0 : index
    %15 = vector.load %arg6[%c0_12, %c0_13] : memref<4x32xf32, #tpu.memory_space<vmem>>, vector<4x32xf32>
    %cst_14 = arith.constant dense<0.000000e+00> : vector<4x512xf32>
    %16 = tpu.matmul %15, %14, %cst_14 {dimension_numbers = #tpu.dot_dimension_numbers<[1], [0], [0], [1], [0, 0, 1, 1], [], []>} : vector<4x32xf32>, vector<32x512xf32>, vector<4x512xf32> -> vector<4x512xf32>
    %c0_15 = arith.constant 0 : index
    %c0_16 = arith.constant 0 : index
    %17 = vector.load %arg7[%c0_15, %c0_16] : memref<4x1xf32, #tpu.memory_space<vmem>>, vector<4x1xf32>
    %18 = vector.broadcast %17 : vector<4x1xf32> to vector<4x512xf32>
    %19 = arith.addf %16, %18 : vector<4x512xf32>
    %20 = math.tanh %19 : vector<4x512xf32>
    %c0_17 = arith.constant 0 : index
    %c0_18 = arith.constant 0 : index
    %21 = vector.load %arg8[%c0_17, %c0_18] : memref<4x512xf32, #tpu.memory_space<vmem>>, vector<4x512xf32>
    tpu.vector_store %arg8[%c0_17, %c0_18], %20 {strides = array<i32>} : memref<4x512xf32, #tpu.memory_space<vmem>>, vector<4x512xf32>,
    return
  }
  func.func @transform_0(%arg0: i32) -> (i32, i32) {
    %c0_i32 = arith.constant 0 : i32
    %c0_i32_0 = arith.constant 0 : i32
    return %c0_i32, %arg0 : i32, i32
  }
  func.func @transform_1(%arg0: i32) -> (i32, i32) {
    %c0_i32 = arith.constant 0 : i32
    %c0_i32_0 = arith.constant 0 : i32
    %c0_i32_1 = arith.constant 0 : i32
    return %c0_i32, %c0_i32_0 : i32, i32
  }
  func.func @transform_2(%arg0: i32) -> (i32, i32) {
    %c0_i32 = arith.constant 0 : i32
    %c0_i32_0 = arith.constant 0 : i32
    %c0_i32_1 = arith.constant 0 : i32
    return %c0_i32, %c0_i32_0 : i32, i32
  }
  func.func @transform_3(%arg0: i32) -> (i32, i32) {
    %c0_i32 = arith.constant 0 : i32
    %c0_i32_0 = arith.constant 0 : i32
    %c0_i32_1 = arith.constant 0 : i32
    return %c0_i32, %c0_i32_0 : i32, i32
  }
  func.func @transform_4(%arg0: i32) -> (i32, i32) {
    %c0_i32 = arith.constant 0 : i32
    %c0_i32_0 = arith.constant 0 : i32
    %c0_i32_1 = arith.constant 0 : i32
    return %c0_i32, %c0_i32_0 : i32, i32
  }
  func.func @transform_5(%arg0: i32) -> (i32, i32) {
    %c0_i32 = arith.constant 0 : i32
    %c0_i32_0 = arith.constant 0 : i32
    %c0_i32_1 = arith.constant 0 : i32
    return %c0_i32, %c0_i32_0 : i32, i32
  }
  func.func @transform_6(%arg0: i32) -> (i32, i32) {
    %c0_i32 = arith.constant 0 : i32
    %c0_i32_0 = arith.constant 0 : i32
    %c0_i32_1 = arith.constant 0 : i32
    return %c0_i32, %c0_i32_0 : i32, i32
  }
  func.func @transform_7(%arg0: i32) -> (i32, i32) {
    %c0_i32 = arith.constant 0 : i32
    %c0_i32_0 = arith.constant 0 : i32
    return %c0_i32, %arg0 : i32, i32
  }
}

</mosaic_0001>

<bundles_post_ra>
// kernel: tpu_custom_call.1
= control target key start
LH: loop header
LB: loop body
LE: loop exit
PB: predicated region body
PF: predicated region fallthrough
CT: control target
= control target key end

     0   :  { %12 = vsyncpa [#allocation3], 0  ;;  %s1404_s0 = inlined_call_operand.vmem [shape: f32[8,1024], index: 0, kind: input, shape index: {}]   ;;  %s1405_s1 = inlined_call_operand.vmem [shape: f32[32,8], index: 1, kind: input, shape index: {}]   ;;  %s1406_s2 = inlined_call_operand.vmem [shape: f32[32,1], index: 2, kind: input, shape index: {}]   ;;  %s1407_s3 = inlined_call_operand.vmem [shape: f32[32,32], index: 3, kind: input, shape index: {}]   ;;  %s1408_s4 = inlined_call_operand.vmem [shape: f32[32,1], index: 4, kind: input, shape index: {}]   ;;  %s1409_s5 = inlined_call_operand.vmem [shape: f32[4,32], index: 5, kind: input, shape index: {}]   ;;  %s1410_s6 = inlined_call_operand.vmem [shape: f32[4,1], index: 6, kind: input, shape index: {}]   ;;  %s1411_s7 = inlined_call_operand.hbm [shape: f32[4,1024], index: 7, kind: output, shape index: {}]  }
   0x1   :  { %14 = vsyncpa [#allocation3 + $0x1], 0  ;;  %s1215_s24 = smov 0   ;;  %s1217_s25 = smov 0  }
   0x2   :  { %s1219_s26 = smov 0   ;;  %s1221_s27 = smov 0  }
   0x3 LB: > { %s1236_s28 = sadd.s32 4294967295, %s1170_s27   ;;  %s994_s29 = sadd.s32 4294967294, %s1170_s27   ;;  %s1170_s27 = sphi %s1221_s27, %s1417_s27   ;;  %s1166_s26 = sphi %s1219_s26, %s1416_s26   ;;  %s1162_s25 = sphi %s1217_s25, %s1415_s25   ;;  %s1158_s24 = sphi %s1215_s24, %s1414_s24  }
   0x4   : > { %s1240_s30 = sadd.s32 1, %s1170_s27   ;;  %s179_s8 = sadd.s32 1, %s1166_s26 }
   0x5   : > { %s176_s9 = ssub.s32 %s1170_s27, %s1240_s30  ;;  %p189_p0 = scmp.ne.s32.totalorder %s1166_s26, %s1162_s25 }
   0x6   : > { %p177_p1 = scmp.eq.s32.totalorder %s176_s9, 0  ;;  %p190_p2 = scmp.eq.s32.totalorder %s1236_s28, 1 }
   0x7   : > { %p195_p3 = scmp.ne.s32.totalorder %s1162_s25, %s1158_s24  ;;  %p196_p4 = scmp.eq.s32.totalorder %s994_s29, 1 }
   0x8   : > { %s1251_s10 = scalar_select %p177_p1, %s1166_s26, %s179_s8  }
   0x9   : > { %p1253_p5 = por %p190_p2, %p189_p0  ;;  %p1257_p6 = por %p196_p4, %p195_p3 }
   0xa   : > { %p997_p7 = scmp.ge.s32.totalorder %s1170_s27, 1  ;;  %p241_p8 = scmp.lt.s32.totalorder %s1170_s27, 3 }
   0xc   : > { %p242_p9 = pnand %p997_p7, %p241_p8 }
   0xd   : > { %s999_s13 = sshll.u32 (!%p242_p9), %s1236_s28, 2  ;;  %v1172_v0 = vmov (!%p242_p9), 0.0   ;;  %v288_v1 = vld [vmem:[%s1406_s2] sm:$0xff] (!%p242_p9)  ;;  %v1173_v2 = vmov (!%p242_p9), 0   ;;  %v290_v3 = vld [vmem:[%s1406_s2 + $0x10] sm:$0xff] (!%p242_p9)  ;;  %v289_v4 = vld [vmem:[%s1406_s2 + $0x8] sm:$0xff] (!%p242_p9) }
   0xe   : > { %245 = sbr.rel (%p242_p9) target bundleno = 741 (0x2e5), region = 48  ;;  %p274_p10 = scmp.lt.s32.totalorder (!%p242_p9), %s999_s13, 7  ;;  %389 = vmatprep.mubr.f32.mxu0 (!%p242_p9), %v1172_v0  ;;  %478 = vmatprep.mubr.f32.mxu1 (!%p242_p9), %v1172_v0  ;;  %v291_v5 = vld [vmem:[%s1406_s2 + $0x18] sm:$0xff] (!%p242_p9)  ;;  %v284_v6 = vld [vmem:[%s1405_s1] sm:$0xff] (!%p242_p9)  ;;  %vm312_vm0 = vcmask (!%p242_p9), 64512   ;;  %v524_v12 = vld [vmem:[%s1408_s4 + $0x8] sm:$0xff] (!%p242_p9) }
   0xf   : > { %1098 = vset.pattern.permute.xlu0 (!%p242_p9), %v1173_v2  ;;  %1099 = vset.pattern.permute.xlu1 (!%p242_p9), %v1173_v2  ;;  %v523_v11 = vld [vmem:[%s1408_s4] sm:$0xff] (!%p242_p9)  ;;  %v285_v13 = vld [vmem:[%s1405_s1 + $0x8] sm:$0xff] (!%p242_p9)  ;;  %v525_v14 = vld [vmem:[%s1408_s4 + $0x10] sm:$0xff] (!%p242_p9)  ;;  %vm547_vm1 = vcmask (!%p242_p9), 261120   ;;  %s270_s9 = sand.u32 (!%p242_p9), 1, %s1162_s25   ;;  %s1174_s21 = smov (!%p242_p9), [#allocation2]  }
  0x10   : > { %294 = vperm.xlu0 (!%p242_p9), %1098, %v288_v1   ;;  %304 = vperm.xlu1 (!%p242_p9), %1099, %v290_v3   ;;  %v526_v15 = vld [vmem:[%s1408_s4 + $0x18] sm:$0xff] (!%p242_p9)  ;;  %v286_v16 = vld [vmem:[%s1405_s1 + $0x10] sm:$0xff] (!%p242_p9)  ;;  %v755_v17 = vld [vmem:[%s1410_s6] sm:$0xf] (!%p242_p9)  ;;  %s998_s14 = sshll.u32 (!%p242_p9), %s270_s9, 4  ;;  %s921_s20 = scalar_lea.sflag (!%p242_p9), [#allocation3], %s270_s9 }
  0x11   : > { %v287_v18 = vld [vmem:[%s1405_s1 + $0x18] sm:$0xff] (!%p242_p9)  ;;  %s272_s15 = scalar_lea.vmem (!%p242_p9), [#allocation2], %s998_s14 }
  0x12   : > { %s935_s16 = sshll.u32 (!%p242_p9), %s272_s15, 4  ;;  %s1364_s16 = int_to_ptr.vmem [resolvable:$true] %s935_s16 }
  0x14   : > { %299 = vperm.xlu0 (!%p242_p9), %1098, %v289_v4   ;;  %309 = vperm.xlu1 (!%p242_p9), %1099, %v291_v5  }
  0x15   : > { %s1419_s13 = smov (!%p274_p10, %s999_s13), 7 }
  0x16   : > { %s1000_s22 = sshll.u32 %s1419_s13, 3  ;;  %s1024_s13 = sshll.u32 %s1236_s28, 8 }
  0x17   : > { %s277_s8 = scalar_lea.vmem %s1404_s0, %s1000_s22  ;;  %s1362_s19 = scalar_lea.hbm %s1411_s7, %s1024_s13 }
  0x18   : > { %v281_v7 = vld [vmem:[%s277_s8 + $0x8] sm:$0xff]  ;;  %v283_v8 = vld [vmem:[%s277_s8 + $0x18] sm:$0xff]  ;;  %v280_v9 = vld [vmem:[%s277_s8] sm:$0xff]  ;;  %529 = vperm.xlu0 %1098, %v523_v11   ;;  %534 = vperm.xlu1 %1099, %v524_v12   ;;  %s1108_s28 = scalar_lea.vmem %s1364_s16, 256  ;;  %s1112_s22 = sshll.u32 %s1174_s21, 4  ;;  %s1113_s22 = int_to_ptr.vmem [resolvable:$false] %s1112_s22 }
  0x19   : > { %325 = vmatprep.subr.mxu0 %v281_v7  ;;  %414 = vmatprep.subr.mxu1 %v283_v8  ;;  %v282_v10 = vld [vmem:[%s277_s8 + $0x10] sm:$0xff]  ;;  %p1109_p11 = scmp.ne.s32.totalorder %s1364_s16, %s1108_s28  ;;  %s1114_s23 = scalar_lea.vmem %s1113_s22, 512 }
  0x1a   : > { %326 = vmatpush1.msra.mxu0 %v280_v9  ;;  %415 = vmatpush1.msra.mxu1 %v282_v10  ;;  %p1115_p0 = scmp.lt.s32.totalorder %s1364_s16, %s1113_s22  ;;  %p1116_p1 = scmp.lt.s32.totalorder %s1114_s23, %s1108_s28 }
  0x1b   : > { %1001 = vmatmul.mubr.msk.f32.vlgmr.msra.gmra.mrb[0].mxu0 %vm312_vm0, %v284_v6  ;;  %1005 = vmatmul.mubr.msk.f32.vlgmr.msra.gmra.mrb[0].mxu1 %vm312_vm0, %v284_v6  ;;  %p1110_p12 = pnand %p1109_p11, %p1253_p5 }
  0x1c   : > { %395 = vmatprep.mubr.f32.mxu0 %v1172_v0  ;;  %484 = vmatprep.mubr.f32.mxu1 %v1172_v0  ;;  %p1117_p2 = por %p1116_p1, %p1115_p0 }
  0x1d   : > { %539 = vperm.xlu0 %1098, %v525_v14   ;;  %544 = vperm.xlu1 %1099, %v526_v15   ;;  %p1111_p13 = pneg %p1110_p12 }
  0x1f   : > { %1002 = vmatmul.mubr.msk.f32.gmra.mrb[2].mxu0 %vm312_vm0, %v285_v13  ;;  %1006 = vmatmul.mubr.msk.f32.gmra.mrb[2].mxu1 %vm312_vm0, %v285_v13  ;;  %p1118_p3 = pnand %p1117_p2, %p1111_p13 }
  0x20   : > { %401 = vmatprep.mubr.f32.mxu0 %v1172_v0  ;;  %490 = vmatprep.mubr.f32.mxu1 %v1172_v0 }
  0x21   : > { %758 = vperm.xlu0 %1098, %v755_v17   ;;  %v520_v17 = vld [vmem:[%s1407_s3 + $0x8] sm:$0xff] }
  0x23   : > { %1003 = vmatmul.mubr.msk.f32.gmra.mrb[4].mxu0 %vm312_vm0, %v286_v16  ;;  %1007 = vmatmul.mubr.msk.f32.gmra.mrb[4].mxu1 %vm312_vm0, %v286_v16  ;;  %v519_v16 = vld [vmem:[%s1407_s3] sm:$0xff] }
  0x24   : > { %407 = vmatprep.mubr.f32.mxu0 %v1172_v0  ;;  %496 = vmatprep.mubr.f32.mxu1 %v1172_v0 }
  0x27   : > { %1004 = vmatmul.mubr.msk.f32.gmra.mrb[6].mxu0 %vm312_vm0, %v287_v18  ;;  %1008 = vmatmul.mubr.msk.f32.gmra.mrb[6].mxu1 %vm312_vm0, %v287_v18  ;;  %v521_v18 = vld [vmem:[%s1407_s3 + $0x10] sm:$0xff] }
  0x28   : > { %624 = vmatprep.mubr.f32.mxu0 %v1172_v0  ;;  %713 = vmatprep.mubr.f32.mxu1 %v1172_v0 }
  0x8f   : > { %v295_v19 = vpop.permute.xlu0 %294  ;;  %v305_v25 = vpop.permute.xlu1 %304 }
  0x93   : > { %v300_v24 = vpop.permute.xlu0 %299  ;;  %v310_v54 = vpop.permute.xlu1 %309 }
  0xee   : > { %v391_v20 = vpop.f32.mrb[0].mxu0  ;;  %v480_v21 = vpop.f32.mrb[0].mxu1 }
  0xef   : > { %v393_v22 = vpop.f32.mrb[1].mxu0  ;;  %v482_v23 = vpop.f32.mrb[1].mxu1  ;;  %v392_v26 = vadd.f32 %v391_v20, %v295_v19  ;;  %v481_v27 = vadd.f32 %v480_v21, %v295_v19 }
  0xf0   : > { %v394_v28 = vadd.f32 %v393_v22, %v295_v19  ;;  %v483_v29 = vadd.f32 %v482_v23, %v295_v19  ;;  %v522_v19 = vld [vmem:[%s1407_s3 + $0x18] sm:$0xff] }
  0xf1   : > { %v503_v38 = vmax.f32 %v392_v26, 0.0  ;;  %v505_v39 = vmax.f32 %v481_v27, 0.0 }
  0xf2   : > { %v397_v30 = vpop.f32.mrb[2].mxu0  ;;  %v486_v31 = vpop.f32.mrb[2].mxu1  ;;  %v504_v42 = vmax.f32 %v394_v28, 0.0  ;;  %v506_v43 = vmax.f32 %v483_v29, 0.0 }
  0xf3   : > { %v398_v32 = vadd.f32 %v397_v30, %v300_v24  ;;  %v487_v33 = vadd.f32 %v486_v31, %v300_v24  ;;  %v399_v34 = vpop.f32.mrb[3].mxu0  ;;  %v488_v35 = vpop.f32.mrb[3].mxu1 }
  0xf4   : > { %v400_v36 = vadd.f32 %v399_v34, %v300_v24  ;;  %v489_v37 = vadd.f32 %v488_v35, %v300_v24  ;;  %v530_v24 = vpop.permute.xlu0 %529 }
  0xf5   : > { %v507_v40 = vmax.f32 %v398_v32, 0.0  ;;  %v509_v41 = vmax.f32 %v487_v33, 0.0 }
  0xf6   : > { %v508_v44 = vmax.f32 %v400_v36, 0.0  ;;  %v510_v45 = vmax.f32 %v489_v37, 0.0  ;;  %v403_v46 = vpop.f32.mrb[4].mxu0  ;;  %v492_v47 = vpop.f32.mrb[4].mxu1 }
  0xf7   : > { %v1027_v48 = vpack.c.bf16 %v507_v40, %v503_v38  ;;  %v1035_v49 = vpack.c.bf16 %v509_v41, %v505_v39  ;;  %v405_v50 = vpop.f32.mrb[5].mxu0  ;;  %v494_v51 = vpop.f32.mrb[5].mxu1  ;;  %v404_v55 = vadd.f32 %v403_v46, %v305_v25  ;;  %v493_v56 = vadd.f32 %v492_v47, %v305_v25 }
  0xf8   : > { %v1025_v52 = vpack.c.bf16 %v508_v44, %v504_v42  ;;  %v1033_v53 = vpack.c.bf16 %v510_v45, %v506_v43  ;;  %v406_v57 = vadd.f32 %v405_v50, %v305_v25  ;;  %v495_v58 = vadd.f32 %v494_v51, %v305_v25  ;;  %v535_v25 = vpop.permute.xlu1 %534  ;;  %v540_v51 = vpop.permute.xlu0 %539 }
  0xf9   : > { %v511_v4 = vmax.f32 %v404_v55, 0.0  ;;  %v513_v5 = vmax.f32 %v493_v56, 0.0 }
  0xfa   : > { %v409_v59 = vpop.f32.mrb[6].mxu0  ;;  %v498_v60 = vpop.f32.mrb[6].mxu1  ;;  %1026 = vmatprep.subr.bf16.mxu0 %v1025_v52  ;;  %1034 = vmatprep.subr.bf16.mxu1 %v1033_v53  ;;  %v512_v8 = vmax.f32 %v406_v57, 0.0  ;;  %v514_v9 = vmax.f32 %v495_v58, 0.0 }
  0xfb   : > { %v410_v61 = vadd.f32 %v409_v59, %v310_v54  ;;  %v499_v62 = vadd.f32 %v498_v60, %v310_v54  ;;  %v411_v63 = vpop.f32.mrb[7].mxu0  ;;  %v500_v1 = vpop.f32.mrb[7].mxu1  ;;  %1028 = vmatpush1.bf16.msra.mxu0 %v1027_v48  ;;  %1036 = vmatpush1.bf16.msra.mxu1 %v1035_v49 }
  0xfc   : > { %v412_v2 = vadd.f32 %v411_v63, %v310_v54  ;;  %v501_v3 = vadd.f32 %v500_v1, %v310_v54  ;;  %v545_v54 = vpop.permute.xlu1 %544 }
  0xfd   : > { %v515_v6 = vmax.f32 %v410_v61, 0.0  ;;  %v517_v7 = vmax.f32 %v499_v62, 0.0 }
  0xfe   : > { %v516_v10 = vmax.f32 %v412_v2, 0.0  ;;  %v518_v11 = vmax.f32 %v501_v3, 0.0 }
  0xff   : > { %v1031_v12 = vpack.c.bf16 %v515_v6, %v511_v4  ;;  %v1039_v13 = vpack.c.bf16 %v517_v7, %v513_v5 }
 0x100   : > { %v1029_v14 = vpack.c.bf16 %v516_v10, %v512_v8  ;;  %v1037_v15 = vpack.c.bf16 %v518_v11, %v514_v9 }
 0x102   : > { %1030 = vmatprep.subr.bf16.mxu0 %v1029_v14  ;;  %1038 = vmatprep.subr.bf16.mxu1 %v1037_v15 }
 0x103   : > { %1032 = vmatpush1.bf16.msra.mxu0 %v1031_v12  ;;  %1040 = vmatpush1.bf16.msra.mxu1 %v1039_v13 }
 0x106   : > { %1009 = vmatmul.mubr.msk.f32.vlgmr.msra.gmra.mrb[8].mxu0 %vm547_vm1, %v519_v16  ;;  %1013 = vmatmul.mubr.msk.f32.vlgmr.msra.gmra.mrb[8].mxu1 %vm547_vm1, %v519_v16  ;;  %v754_v16 = vld [vmem:[%s1409_s5] sm:$0xf] }
 0x107   : > { %630 = vmatprep.mubr.f32.mxu0 %v1172_v0  ;;  %719 = vmatprep.mubr.f32.mxu1 %v1172_v0 }
 0x10a   : > { %1010 = vmatmul.mubr.msk.f32.gmra.mrb[10].mxu0 %vm547_vm1, %v520_v17  ;;  %1014 = vmatmul.mubr.msk.f32.gmra.mrb[10].mxu1 %vm547_vm1, %v520_v17  ;;  %v759_v17 = vpop.permute.xlu0 %758 }
 0x10b   : > { %636 = vmatprep.mubr.f32.mxu0 %v1172_v0  ;;  %725 = vmatprep.mubr.f32.mxu1 %v1172_v0 }
 0x10e   : > { %1011 = vmatmul.mubr.msk.f32.gmra.mrb[12].mxu0 %vm547_vm1, %v521_v18  ;;  %1015 = vmatmul.mubr.msk.f32.gmra.mrb[12].mxu1 %vm547_vm1, %v521_v18 }
 0x10f   : > { %642 = vmatprep.mubr.f32.mxu0 %v1172_v0  ;;  %731 = vmatprep.mubr.f32.mxu1 %v1172_v0 }
 0x112   : > { %1012 = vmatmul.mubr.msk.f32.gmra.mrb[14].mxu0 %vm547_vm1, %v522_v19  ;;  %1016 = vmatmul.mubr.msk.f32.gmra.mrb[14].mxu1 %vm547_vm1, %v522_v19 }
 0x113   : > { %828 = vmatprep.mubr.f32.mxu0 %v1172_v0  ;;  %899 = vmatprep.mubr.f32.mxu1 %v1172_v0 }
 0x1d9   : > { %v626_v20 = vpop.f32.mrb[8].mxu0  ;;  %v715_v21 = vpop.f32.mrb[8].mxu1 }
 0x1da   : > { %v628_v22 = vpop.f32.mrb[9].mxu0  ;;  %v717_v23 = vpop.f32.mrb[9].mxu1  ;;  %v627_v26 = vadd.f32 %v626_v20, %v530_v24  ;;  %v716_v27 = vadd.f32 %v715_v21, %v530_v24 }
 0x1db   : > { %v629_v28 = vadd.f32 %v628_v22, %v530_v24  ;;  %v718_v29 = vadd.f32 %v717_v23, %v530_v24 }
 0x1dc   : > { %v738_v38 = vmax.f32 %v627_v26, 0.0  ;;  %v740_v0 = vmax.f32 %v716_v27, 0.0 }
 0x1dd   : > { %v632_v30 = vpop.f32.mrb[10].mxu0  ;;  %v721_v31 = vpop.f32.mrb[10].mxu1  ;;  %v739_v41 = vmax.f32 %v629_v28, 0.0  ;;  %v741_v42 = vmax.f32 %v718_v29, 0.0 }
 0x1de   : > { %v633_v32 = vadd.f32 %v632_v30, %v535_v25  ;;  %v722_v33 = vadd.f32 %v721_v31, %v535_v25  ;;  %v634_v34 = vpop.f32.mrb[11].mxu0  ;;  %v723_v35 = vpop.f32.mrb[11].mxu1 }
 0x1df   : > { %v635_v36 = vadd.f32 %v634_v34, %v535_v25  ;;  %v724_v37 = vadd.f32 %v723_v35, %v535_v25 }
 0x1e0   : > { %v742_v39 = vmax.f32 %v633_v32, 0.0  ;;  %v744_v40 = vmax.f32 %v722_v33, 0.0 }
 0x1e1   : > { %v743_v43 = vmax.f32 %v635_v36, 0.0  ;;  %v745_v44 = vmax.f32 %v724_v37, 0.0  ;;  %v638_v45 = vpop.f32.mrb[12].mxu0  ;;  %v727_v46 = vpop.f32.mrb[12].mxu1 }
 0x1e2   : > { %v1043_v47 = vpack.c.bf16 %v742_v39, %v738_v38  ;;  %v1051_v48 = vpack.c.bf16 %v744_v40, %v740_v0  ;;  %v640_v49 = vpop.f32.mrb[13].mxu0  ;;  %v729_v50 = vpop.f32.mrb[13].mxu1  ;;  %v639_v55 = vadd.f32 %v638_v45, %v540_v51  ;;  %v728_v56 = vadd.f32 %v727_v46, %v540_v51 }
 0x1e3   : > { %v1041_v52 = vpack.c.bf16 %v743_v43, %v739_v41  ;;  %v1049_v53 = vpack.c.bf16 %v745_v44, %v741_v42  ;;  %v641_v57 = vadd.f32 %v640_v49, %v540_v51  ;;  %v730_v58 = vadd.f32 %v729_v50, %v540_v51 }
 0x1e4   : > { %v746_v4 = vmax.f32 %v639_v55, 0.0  ;;  %v748_v5 = vmax.f32 %v728_v56, 0.0 }
 0x1e5   : > { %v644_v59 = vpop.f32.mrb[14].mxu0  ;;  %v733_v60 = vpop.f32.mrb[14].mxu1  ;;  %1042 = vmatprep.subr.bf16.mxu0 %v1041_v52  ;;  %1050 = vmatprep.subr.bf16.mxu1 %v1049_v53  ;;  %v747_v8 = vmax.f32 %v641_v57, 0.0  ;;  %v749_v9 = vmax.f32 %v730_v58, 0.0 }
 0x1e6   : > { %v645_v61 = vadd.f32 %v644_v59, %v545_v54  ;;  %v734_v62 = vadd.f32 %v733_v60, %v545_v54  ;;  %v646_v63 = vpop.f32.mrb[15].mxu0  ;;  %v735_v1 = vpop.f32.mrb[15].mxu1  ;;  %1044 = vmatpush1.bf16.msra.mxu0 %v1043_v47  ;;  %1052 = vmatpush1.bf16.msra.mxu1 %v1051_v48 }
 0x1e7   : > { %v647_v2 = vadd.f32 %v646_v63, %v545_v54  ;;  %v736_v3 = vadd.f32 %v735_v1, %v545_v54 }
 0x1e8   : > { %v750_v6 = vmax.f32 %v645_v61, 0.0  ;;  %v752_v7 = vmax.f32 %v734_v62, 0.0 }
 0x1e9   : > { %v751_v10 = vmax.f32 %v647_v2, 0.0  ;;  %v753_v11 = vmax.f32 %v736_v3, 0.0 }
 0x1ea   : > { %v1047_v12 = vpack.c.bf16 %v750_v6, %v746_v4  ;;  %v1055_v13 = vpack.c.bf16 %v752_v7, %v748_v5 }
 0x1eb   : > { %v1045_v14 = vpack.c.bf16 %v751_v10, %v747_v8  ;;  %v1053_v15 = vpack.c.bf16 %v753_v11, %v749_v9 }
 0x1ed   : > { %1046 = vmatprep.subr.bf16.mxu0 %v1045_v14  ;;  %1054 = vmatprep.subr.bf16.mxu1 %v1053_v15 }
 0x1ee   : > { %1048 = vmatpush1.bf16.msra.mxu0 %v1047_v12  ;;  %1056 = vmatpush1.bf16.msra.mxu1 %v1055_v13 }
 0x1f1   : > { %1017 = vmatmul.mubr.msk.f32.vlgmr.msra.gmra.mrb[16].mxu0 %vm547_vm1, %v754_v16  ;;  %1018 = vmatmul.mubr.msk.f32.vlgmr.msra.gmra.mrb[16].mxu1 %vm547_vm1, %v754_v16 }
 0x2c4   : > { %v830_v18 = vpop.f32.mrb[16].mxu0  ;;  %v901_v19 = vpop.f32.mrb[16].mxu1 }
 0x2c5   : > { %v831_v20 = vadd.f32 %v830_v18, %v759_v17  ;;  %v902_v21 = vadd.f32 %v901_v19, %v759_v17  ;;  %v832_v22 = vpop.f32.mrb[17].mxu0  ;;  %v903_v23 = vpop.f32.mrb[17].mxu1 }
 0x2c6   : > { %v833_v24 = vadd.f32 %v832_v22, %v759_v17  ;;  %v904_v25 = vadd.f32 %v903_v23, %v759_v17 }
 0x2c7   : > { %1100 = vtanh.f32 %v831_v20 }
 0x2c8   : > { %1102 = vtanh.f32 %v902_v21 }
 0x2c9   : > { %1104 = vtanh.f32 %v833_v24 }
 0x2ca   : > { %1106 = vtanh.f32 %v904_v25 }
 0x2d1   : > { %v1101_v26 = vpop.eup %1100 }
 0x2d2   : > { %v1103_v27 = vpop.eup %1102 }
 0x2d3   : > { %v1105_v28 = vpop.eup %1104 }
 0x2d4   : > { %v1107_v29 = vpop.eup %1106  ;;  %v914_v30 = vcombine.low %v1101_v26, %v1105_v28 }
 0x2d5   : > { %v915_v31 = vcombine.low %v1103_v27, %v1107_v29 }
 0x2d6   : > { %918 = vst [vmem:[%s272_s15] sm:$0xff] %v914_v30 }
 0x2d7   : > { %919 = vst [vmem:[%s272_s15 + $0x8] sm:$0xff] %v915_v31 }
 0x2d8   : > { %1121 = shalt.err (!%p1118_p3)
}
 0x2d9   : > { %s1122_s29 = scalar_lea.hbm %s1362_s19, 256  ;;  %s1126_s14 = scalar_lea.hbm %s1411_s7, 512 }
 0x2da   : > { %p1123_p4 = scmp.ne.s32.totalorder %s1362_s19, %s1122_s29  ;;  %p1127_p9 = scmp.lt.u32.totalorder %s1362_s19, %s1411_s7 }
 0x2db   : > { %p1128_p10 = scmp.lt.u32.totalorder %s1126_s14, %s1122_s29  ;;  %p1130_p12 = scmp.lt.u32.totalorder %s1122_s29, %s1362_s19 }
 0x2dc   : > { %p1124_p7 = pnand %p1123_p4, %p1253_p5 }
 0x2dd   : > { %p1129_p11 = por %p1128_p10, %p1127_p9 }
 0x2de   : > { %p1125_p8 = pneg %p1124_p7 }
 0x2df   : > { %p1131_p13 = por %p1130_p12, %p1129_p11 }
 0x2e1   : > { %p1132_p0 = pnand %p1131_p13, %p1125_p8 }
 0x2e3   : > { %1135 = shalt.err (!%p1132_p0)
}
 0x2e4   : > { %1057 = dma.vmem_to_hbm [thread:$0]  (%p1253_p5), %s1364_s16, 256, %s1362_s19, %s921_s20  }
 0x2e5 PF: > { %p1063_p1 = scmp.ge.s32.totalorder %s1170_s27, 2  ;;  %s947_s17 = sand.u32 1, %s1158_s24  }
 0x2e6   : > { %s948_s18 = scalar_lea.sflag [#allocation3], %s947_s17 }
 0x2e7   : > { %p1060_p2 = pnand %p1063_p1, %p1257_p6 }
 0x2e9   : > { %1153 = dma.done.wait (!%p1060_p2), %s948_s18, 256  }
 0x2ea   : > { %1155 = vsyncadd (!%p1060_p2), %s948_s18, 4294967040  ;;  %p17_p3 = scmp.ge.s32.totalorder %s1240_s30, 4   ;;  %s1414_s24 = smov %s1162_s25 }
 0x2eb   : > { %s1415_s25 = smov %s1166_s26  ;;  %s1416_s26 = smov %s1251_s10 }
 0x2ec   : > { %s1417_s27 = smov %s1240_s30  ;;  %19 = sbr.rel (!%p17_p3) target bundleno = 3 (0x3), region = 83 }
 0x2f3   :  { %953 = vsyncpa [#allocation3], 1 }
 0x2f4   :  { %955 = vsyncpa [#allocation3 + $0x1], 1 }

</bundles_post_ra>
